<compile_context>
chip_gen: v7x
topology: tpu7x:2x2x1
jax: 0.10.0
libtpu: 0.0.40
codegen_flags: <defaults>
</compile_context>

<pallas_src>
import functools

import jax
import jax.numpy as jnp
from jax.experimental import pallas as pl
from jax.experimental.pallas import tpu as pltpu


def _ce_partial_kernel(logits_ref, labels_ref, out_ref, *, block_rows, n_rows):
    """Per-block partial cross entropy.

    Writes this block's (loss_sum, valid_count) into its own (1, 8, 128)
    output tile: sublane 0 holds the loss sum, sublane 1 the valid count.
    """
    x = logits_ref[...]                                    # (tm, V) native dtype
    labels = labels_ref[...]                               # (tm, 1) int32

    # Row max in the native dtype (max is exact), upcast only the (tm,1) result.
    row_max = jnp.max(x, axis=1, keepdims=True).astype(jnp.float32)     # (tm, 1)

    # Single full-width f32 temporary; its only consumer is exp() (EUP).
    shifted = x.astype(jnp.float32) - row_max                            # (tm, V)
    sum_exp = jnp.sum(jnp.exp(shifted), axis=1, keepdims=True)           # (tm, 1)

    # Gather logits[row, label[row]] from the RAW tile via iota compare
    # (label = -1 never matches any column); upcast only the (tm,1) result.
    col = jax.lax.broadcasted_iota(jnp.int32, x.shape, 1)                # (tm, V)
    sel = jnp.sum(jnp.where(col == labels, x, jnp.zeros([], x.dtype)),
                  axis=1, keepdims=True).astype(jnp.float32)             # (tm, 1)

    # per-row CE = logsumexp(x) - x[label] = log(sum_exp) + row_max - sel
    per_row = jnp.log(sum_exp) + row_max - sel                           # (tm, 1)

    # Valid rows: label != -1 AND the row physically exists (masks the ragged
    # tail block, whose data is undefined).  This select happens BEFORE any
    # block-level sum so tail inf/NaN cannot leak.
    local_rows = jax.lax.broadcasted_iota(jnp.int32, (block_rows, 1), 0)
    global_rows = pl.program_id(0) * block_rows + local_rows
    valid = (labels != -1) & (global_rows < n_rows)                      # (tm, 1)

    per_row = jnp.where(valid, per_row, 0.0)
    block_sum = jnp.sum(per_row)
    block_cnt = jnp.sum(valid.astype(jnp.float32))

    sub = jax.lax.broadcasted_iota(jnp.int32, (1, 8, 128), 1)
    out_ref[...] = jnp.where(sub == 0, block_sum,
                             jnp.where(sub == 1, block_cnt, 0.0))


def _pick_tiling(n_rows, vocab, itemsize, requested_block_rows):
    """Choose block_rows and vmem_limit from dtype + per-core VMEM capacity."""
    try:
        vmem_cap = int(getattr(pltpu.get_tpu_info(), "vmem_capacity_bytes", 0) or 0)
    except Exception:
        vmem_cap = 0
    if vmem_cap <= 0:
        vmem_cap = 64 << 20          # conservative: v7x per-TensorCore VMEM

    budget = int(vmem_cap * 0.70)    # headroom for compiler scratch / outputs
    # Live VMEM per tile-row: double-buffered input + ~3 full-width f32 temps.
    per_row = 2 * vocab * itemsize + 3 * vocab * 4
    cap_rows = max(8, (budget // per_row) // 8 * 8)

    block_rows = requested_block_rows if requested_block_rows else 512
    block_rows = max(8, (block_rows // 8) * 8)       # keep a multiple of 8
    block_rows = min(block_rows, cap_rows)

    # Keep >= 2 grid steps so the 'parallel' axis can feed both v7x TensorCores.
    if n_rows > 8:
        block_rows = min(block_rows, max(8, ((pl.cdiv(n_rows, 2) + 7) // 8) * 8))
    block_rows = min(block_rows, max(8, ((n_rows + 7) // 8) * 8))

    est = (2 * block_rows * vocab * itemsize        # double-buffered input
           + 4 * block_rows * vocab * 4             # f32 temps + slack
           + (2 << 20))
    vmem_limit = int(min(vmem_cap * 0.9, max(est, 16 << 20)))
    return block_rows, vmem_limit


def _mlm_cross_entropy_sum_count(logits, labels, block_rows=None):
    """Returns (sum of CE losses over valid rows, number of valid rows).

    logits: [N, V] (f32 or bf16), labels: [N] int32 with -1 = ignore.
    """
    n, v = logits.shape
    labels2d = labels.reshape(n, 1).astype(jnp.int32)

    tm, vmem_limit = _pick_tiling(n, v, jnp.dtype(logits.dtype).itemsize,
                                  block_rows)
    grid_size = pl.cdiv(n, tm)

    kernel = functools.partial(_ce_partial_kernel, block_rows=tm, n_rows=n)

    partials = pl.pallas_call(
        kernel,
        out_shape=jax.ShapeDtypeStruct((grid_size, 8, 128), jnp.float32),
        grid_spec=pltpu.PrefetchScalarGridSpec(
            num_scalar_prefetch=0,
            grid=(grid_size,),
            in_specs=[
                pl.BlockSpec((tm, v), lambda i: (i, 0)),
                pl.BlockSpec((tm, 1), lambda i: (i, 0)),
            ],
            out_specs=pl.BlockSpec((1, 8, 128), lambda i: (i, 0, 0)),
        ),
        compiler_params=pltpu.CompilerParams(
            dimension_semantics=("parallel",),
            vmem_limit_bytes=vmem_limit),
    )(logits, labels2d)

    loss_sum = jnp.sum(partials[:, 0, 0])
    cnt = jnp.sum(partials[:, 1, 0])
    return loss_sum, cnt


def _compact_valid_rows(logits, labels, max_valid_rows):
    """Gather only rows with label != -1 (padded to a static max row count)."""
    valid = labels != -1
    n_valid = jnp.sum(valid.astype(jnp.int32))
    (idx,) = jnp.nonzero(valid, size=max_valid_rows, fill_value=0)
    keep = jnp.arange(max_valid_rows, dtype=jnp.int32) < n_valid
    glogits = jnp.take(logits, idx, axis=0)            # reads only gathered rows
    glabels = jnp.where(keep, jnp.take(labels, idx), jnp.int32(-1))
    return glogits, glabels


def _nsp_cross_entropy_mean(nsp_logits, nsp_labels):
    """2-class CE (ignore_index=-1, mean) in plain JAX: too tiny for a kernel."""
    logits = nsp_logits.astype(jnp.float32)
    lse = jax.scipy.special.logsumexp(logits, axis=-1)
    sel = jnp.take_along_axis(
        logits, jnp.clip(nsp_labels, 0, logits.shape[-1] - 1)[:, None],
        axis=-1)[:, 0]
    valid = nsp_labels != -1
    per = jnp.where(valid, lse - sel, 0.0)
    return jnp.sum(per) / jnp.sum(valid.astype(jnp.float32))


@functools.partial(jax.jit,
                   static_argnames=("vocab_size", "block_rows", "max_valid_rows"))
def bert_pretraining_criterion(prediction_scores, seq_relationship_score,
                               masked_lm_labels, next_sentence_labels,
                               vocab_size, block_rows=None, max_valid_rows=None):
    # MLM cross entropy (ignore_index=-1, mean over valid tokens) in Pallas.
    mlm_logits = prediction_scores.reshape(-1, vocab_size)
    mlm_labels = masked_lm_labels.reshape(-1).astype(jnp.int32)

    if max_valid_rows is not None:
        # Sparsity lever: max_valid_rows must be an UPPER BOUND on the number
        # of labeled tokens (e.g. batch * max_predictions_per_seq).
        mlm_logits, mlm_labels = _compact_valid_rows(
            mlm_logits, mlm_labels, max_valid_rows)

    mlm_sum, mlm_cnt = _mlm_cross_entropy_sum_count(
        mlm_logits, mlm_labels, block_rows=block_rows)
    masked_lm_loss = mlm_sum / mlm_cnt   # NaN if no valid tokens (torch 0/0)

    # NSP cross entropy (2 classes, ignore_index=-1, mean) in plain JAX.
    next_sentence_loss = _nsp_cross_entropy_mean(
        seq_relationship_score.reshape(-1, 2),
        next_sentence_labels.reshape(-1).astype(jnp.int32))

    return masked_lm_loss + next_sentence_loss


def _reference_loss(prediction_scores, seq_relationship_score,
                    masked_lm_labels, next_sentence_labels, vocab_size):
    """Pure-JAX reference matching torch CrossEntropyLoss(ignore_index=-1)."""
    def ce(logits, labels):
        logits = logits.astype(jnp.float32)
        lse = jax.scipy.special.logsumexp(logits, axis=-1)
        sel = jnp.take_along_axis(
            logits, jnp.clip(labels, 0, logits.shape[-1] - 1)[:, None],
            axis=-1)[:, 0]
        valid = labels != -1
        per = jnp.where(valid, lse - sel, 0.0)
        return jnp.sum(per) / jnp.sum(valid.astype(jnp.float32))
    return (ce(prediction_scores.reshape(-1, vocab_size),
               masked_lm_labels.reshape(-1)) +
            ce(seq_relationship_score.reshape(-1, 2),
               next_sentence_labels.reshape(-1)))


if __name__ == "__main__":
    vocab_size = 512
    batch, seq = 2, 8

    key = jax.random.PRNGKey(0)
    k1, k2, k3, k4, k5 = jax.random.split(key, 5)

    prediction_scores = jax.random.normal(
        k1, (batch, seq, vocab_size), dtype=jnp.float32)
    seq_relationship_score = jax.random.normal(
        k2, (batch, 2), dtype=jnp.float32)

    # Labels: mix of valid token ids and -1 (ignored), like masked LM targets.
    raw_labels = jax.random.randint(
        k3, (batch, seq), 0, vocab_size, dtype=jnp.int32)
    mask = jax.random.bernoulli(k4, p=0.25, shape=(batch, seq))
    masked_lm_labels = jnp.where(mask, raw_labels, jnp.int32(-1))
    next_sentence_labels = jax.random.randint(
        k5, (batch,), 0, 2, dtype=jnp.int32)

    ref = _reference_loss(prediction_scores, seq_relationship_score,
                          masked_lm_labels, next_sentence_labels, vocab_size)

    # 1) Dense f32 path.
    total_loss = bert_pretraining_criterion(
        prediction_scores, seq_relationship_score,
        masked_lm_labels, next_sentence_labels, vocab_size)
    total_loss = jax.block_until_ready(total_loss)
    if not jnp.allclose(total_loss, ref, rtol=1e-5, atol=1e-5):
        raise AssertionError(f"dense f32 mismatch: pallas={total_loss} ref={ref}")

    # 2) Sparsity path: compact valid rows (upper bound = all tokens here).
    total_loss_sparse = bert_pretraining_criterion(
        prediction_scores, seq_relationship_score,
        masked_lm_labels, next_sentence_labels, vocab_size,
        max_valid_rows=batch * seq)
    total_loss_sparse = jax.block_until_ready(total_loss_sparse)
    if not jnp.allclose(total_loss_sparse, ref, rtol=1e-5, atol=1e-5):
        raise AssertionError(
            f"compacted mismatch: pallas={total_loss_sparse} ref={ref}")

    # 3) bf16-streamed logits (half HBM traffic); compare against the reference
    #    evaluated on the same bf16-rounded inputs.
    pred_bf16 = prediction_scores.astype(jnp.bfloat16)
    ref_bf16 = _reference_loss(pred_bf16, seq_relationship_score,
                               masked_lm_labels, next_sentence_labels,
                               vocab_size)
    total_loss_bf16 = bert_pretraining_criterion(
        pred_bf16, seq_relationship_score,
        masked_lm_labels, next_sentence_labels, vocab_size)
    total_loss_bf16 = jax.block_until_ready(total_loss_bf16)
    if not jnp.allclose(total_loss_bf16, ref_bf16, rtol=1e-3, atol=1e-3):
        raise AssertionError(
            f"bf16 mismatch: pallas={total_loss_bf16} ref={ref_bf16}")

    print("KERNEL_OK")
</pallas_src>

<mosaic_0001>
module attributes {stable_mosaic.version = 11 : i64} {
  func.func @_ce_partial_kernel(%arg0: i32, %arg1: memref<8x512xf32, #tpu.memory_space<vmem>>, %arg2: memref<8x1xi32, #tpu.memory_space<vmem>>, %arg3: memref<1x8x128xf32, #tpu.memory_space<vmem>>) attributes {dimension_semantics = [#tpu.dimension_semantics<parallel>], iteration_bounds = array<i64: 2>, scalar_prefetch = 0 : i64, scratch_operands = 0 : i64, tpu.core_type = #tpu.core_type<tc>, window_params = [{transform_indices = @transform_0, window_bounds = array<i64: 8, 512>}, {transform_indices = @transform_1, window_bounds = array<i64: 8, 1>}, {transform_indices = @transform_2, window_bounds = array<i64: 1, 8, 128>}]} {
    %c0 = arith.constant 0 : index
    %c0_0 = arith.constant 0 : index
    %0 = vector.load %arg1[%c0, %c0_0] : memref<8x512xf32, #tpu.memory_space<vmem>>, vector<8x512xf32>
    %c0_1 = arith.constant 0 : index
    %c0_2 = arith.constant 0 : index
    %1 = vector.load %arg2[%c0_1, %c0_2] : memref<8x1xi32, #tpu.memory_space<vmem>>, vector<8x1xi32>
    %cst = arith.constant dense<0xFF800000> : vector<8xf32>
    %2 = vector.multi_reduction <maximumf>, %0, %cst [1] : vector<8x512xf32> to vector<8xf32>
    %3 = vector.shape_cast %2 : vector<8xf32> to vector<8x1xf32>
    %4 = vector.broadcast %3 : vector<8x1xf32> to vector<8x512xf32>
    %5 = arith.subf %0, %4 : vector<8x512xf32>
    %6 = math.exp %5 : vector<8x512xf32>
    %cst_3 = arith.constant dense<0.000000e+00> : vector<8xf32>
    %7 = vector.multi_reduction <add>, %6, %cst_3 [1] : vector<8x512xf32> to vector<8xf32>
    %8 = vector.shape_cast %7 : vector<8xf32> to vector<8x1xf32>
    %9 = tpu.iota {dimensions = array<i32: 1>} : vector<8x512xi32>
    %10 = vector.broadcast %1 : vector<8x1xi32> to vector<8x512xi32>
    %11 = arith.cmpi eq, %9, %10 : vector<8x512xi32>
    %cst_4 = arith.constant 0.000000e+00 : f32
    %12 = vector.broadcast %cst_4 : f32 to vector<8x512xf32>
    %13 = arith.select %11, %0, %12 : vector<8x512xi1>, vector<8x512xf32>
    %cst_5 = arith.constant dense<0.000000e+00> : vector<8xf32>
    %14 = vector.multi_reduction <add>, %13, %cst_5 [1] : vector<8x512xf32> to vector<8xf32>
    %15 = vector.shape_cast %14 : vector<8xf32> to vector<8x1xf32>
    %16 = math.log %8 : vector<8x1xf32>
    %17 = arith.addf %16, %3 : vector<8x1xf32>
    %18 = arith.subf %17, %15 : vector<8x1xf32>
    %19 = tpu.iota {dimensions = array<i32: 0>} : vector<8x1xi32>
    %c8_i32 = arith.constant 8 : i32
    %20 = arith.muli %arg0, %c8_i32 : i32
    %21 = vector.broadcast %20 : i32 to vector<8x1xi32>
    %22 = arith.addi %21, %19 : vector<8x1xi32>
    %c-1_i32 = arith.constant -1 : i32
    %23 = vector.broadcast %c-1_i32 : i32 to vector<8x1xi32>
    %24 = arith.cmpi ne, %1, %23 : vector<8x1xi32>
    %c16_i32 = arith.constant 16 : i32
    %25 = vector.broadcast %c16_i32 : i32 to vector<8x1xi32>
    %26 = arith.cmpi slt, %22, %25 : vector<8x1xi32>
    %27 = arith.andi %24, %26 : vector<8x1xi1>
    %cst_6 = arith.constant 0.000000e+00 : f32
    %28 = vector.broadcast %cst_6 : f32 to vector<8x1xf32>
    %29 = arith.select %27, %18, %28 : vector<8x1xi1>, vector<8x1xf32>
    %30 = vector.shape_cast %29 : vector<8x1xf32> to vector<1x8x1xf32>
    %cst_7 = arith.constant dense<0.000000e+00> : vector<1xf32>
    %31 = vector.multi_reduction <add>, %30, %cst_7 [1, 2] : vector<1x8x1xf32> to vector<1xf32>
    %32 = vector.shape_cast %31 : vector<1xf32> to vector<1x1x1xf32>
    %33 = vector.extract %32[0, 0, 0] : f32 from vector<1x1x1xf32>
    %34 = arith.extui %27 : vector<8x1xi1> to vector<8x1xi32>
    %35 = arith.sitofp %34 : vector<8x1xi32> to vector<8x1xf32>
    %36 = vector.shape_cast %35 : vector<8x1xf32> to vector<1x8x1xf32>
    %cst_8 = arith.constant dense<0.000000e+00> : vector<1xf32>
    %37 = vector.multi_reduction <add>, %36, %cst_8 [1, 2] : vector<1x8x1xf32> to vector<1xf32>
    %38 = vector.shape_cast %37 : vector<1xf32> to vector<1x1x1xf32>
    %39 = vector.extract %38[0, 0, 0] : f32 from vector<1x1x1xf32>
    %40 = tpu.iota {dimensions = array<i32: 1>} : vector<1x8x128xi32>
    %c0_i32 = arith.constant 0 : i32
    %41 = vector.broadcast %c0_i32 : i32 to vector<1x8x128xi32>
    %42 = arith.cmpi eq, %40, %41 : vector<1x8x128xi32>
    %c1_i32 = arith.constant 1 : i32
    %43 = vector.broadcast %c1_i32 : i32 to vector<1x8x128xi32>
    %44 = arith.cmpi eq, %40, %43 : vector<1x8x128xi32>
    %cst_9 = arith.constant 0.000000e+00 : f32
    %45 = vector.broadcast %39 : f32 to vector<1x8x128xf32>
    %46 = vector.broadcast %cst_9 : f32 to vector<1x8x128xf32>
    %47 = arith.select %44, %45, %46 : vector<1x8x128xi1>, vector<1x8x128xf32>
    %48 = vector.broadcast %33 : f32 to vector<1x8x128xf32>
    %49 = arith.select %42, %48, %47 : vector<1x8x128xi1>, vector<1x8x128xf32>
    %c0_10 = arith.constant 0 : index
    %c0_11 = arith.constant 0 : index
    %c0_12 = arith.constant 0 : index
    %50 = vector.load %arg3[%c0_10, %c0_11, %c0_12] : memref<1x8x128xf32, #tpu.memory_space<vmem>>, vector<1x8x128xf32>
    tpu.vector_store %arg3[%c0_10, %c0_11, %c0_12], %49 {strides = array<i32>} : memref<1x8x128xf32, #tpu.memory_space<vmem>>, vector<1x8x128xf32>,
    return
  }
  func.func @transform_0(%arg0: i32) -> (i32, i32) {
    %c0_i32 = arith.constant 0 : i32
    %c0_i32_0 = arith.constant 0 : i32
    return %arg0, %c0_i32 : i32, i32
  }
  func.func @transform_1(%arg0: i32) -> (i32, i32) {
    %c0_i32 = arith.constant 0 : i32
    %c0_i32_0 = arith.constant 0 : i32
    return %arg0, %c0_i32 : i32, i32
  }
  func.func @transform_2(%arg0: i32) -> (i32, i32, i32) {
    %c0_i32 = arith.constant 0 : i32
    %c0_i32_0 = arith.constant 0 : i32
    %c0_i32_1 = arith.constant 0 : i32
    return %arg0, %c0_i32, %c0_i32_0 : i32, i32, i32
  }
}

</mosaic_0001>

<bundles_post_ra>
// kernel: bert_pretraining_criterion.1
= control target key start
LH: loop header
LB: loop body
LE: loop exit
PB: predicated region body
PF: predicated region fallthrough
CT: control target
= control target key end

     0   :  { %7 = vsyncpa [#allocation3], 0  ;;  %s618_s0 = inlined_call_operand.hbm [shape: f32[16,512], index: 0, kind: input, shape index: {}]   ;;  %s619_s1 = inlined_call_operand.vmem [shape: s32[16,1], index: 1, kind: input, shape index: {}]   ;;  %s620_s2 = inlined_call_operand.vmem [shape: f32[2,8,128], index: 2, kind: output, shape index: {}]  }
   0x1   :  { %9 = vsyncpa [#allocation3 + $0x1], 0  ;;  %s500_s9 = smov 0   ;;  %s502_s10 = smov 0  }
   0x2   :  { %s504_s11 = smov 0   ;;  %s506_s12 = smov 0  }
   0x3 LB: > { %s519_s13 = sadd.s32 4294967295, %s480_s12   ;;  %s522_s14 = sadd.s32 1, %s480_s12   ;;  %s480_s12 = sphi %s506_s12, %s628_s12   ;;  %s476_s11 = sphi %s504_s11, %s627_s11   ;;  %s472_s10 = sphi %s502_s10, %s626_s10   ;;  %s468_s9 = sphi %s500_s9, %s625_s9  }
   0x4   : > { %s19_s15 = ssub.s32 %s480_s12, %s522_s14  ;;  %s22_s16 = sadd.s32 1, %s476_s11 }
   0x5   : > { %p20_p0 = scmp.eq.s32.totalorder %s19_s15, 0  ;;  %p29_p1 = scmp.ne.s32.totalorder %s476_s11, %s472_s10 }
   0x6   : > { %p30_p2 = scmp.eq.s32.totalorder %s480_s12, 0  ;;  %p35_p3 = scmp.ne.s32.totalorder %s472_s10, %s468_s9 }
   0x7   : > { %s532_s17 = scalar_select %p20_p0, %s476_s11, %s22_s16  }
   0x8   : > { %p31_p4 = por %p30_p2, %p29_p1  ;;  %p36_p5 = scmp.eq.s32.totalorder %s519_s13, 0 }
   0x9   : > { %p370_p6 = scmp.lt.s32.totalorder %s480_s12, 2  ;;  %s111_s19 = sand.u32 1, %s476_s11  }
   0xa   : > { %p536_p7 = por %p36_p5, %p35_p3  ;;  %s348_s20 = sshll.u32 %s111_s19, 5 }
   0xb   : > { %s359_s21 = sshll.u32 %s480_s12, 9  ;;  %s115_s25 = scalar_lea.vmem [#allocation2], %s348_s20 }
   0xc   : > { %s545_s24 = scalar_lea.hbm %s618_s0, %s359_s21  ;;  %s123_s26 = sshll.u32 %s115_s25, 4  ;;  %s547_s26 = int_to_ptr.vmem [resolvable:$true] %s123_s26 }
   0xd   : > { %p549_p8 = pnand %p370_p6, %p31_p4  ;;  %s112_s28 = scalar_lea.sflag [#allocation3], %s111_s19 }
   0xe   : > { %s416_s29 = scalar_lea.hbm %s545_s24, 512  ;;  %s421_s4 = scalar_lea.hbm %s618_s0, 1024 }
   0xf   : > { %p417_p11 = scmp.ne.s32.totalorder %s545_s24, %s416_s29  ;;  %p418_p12 = pneg %p549_p8 }
  0x10   : > { %p422_p1 = scmp.lt.u32.totalorder %s545_s24, %s618_s0  ;;  %p423_p2 = scmp.lt.u32.totalorder %s421_s4, %s416_s29 }
  0x11   : > { %p419_p13 = pnand %p418_p12, %p417_p11  ;;  %p425_p4 = scmp.lt.u32.totalorder %s416_s29, %s545_s24 }
  0x12   : > { %p424_p3 = por %p423_p2, %p422_p1 }
  0x13   : > { %p420_p0 = pneg %p419_p13 }
  0x14   : > { %p426_p5 = por %p425_p4, %p424_p3 }
  0x16   : > { %p427_p6 = pnand %p426_p5, %p420_p0 }
  0x18   : > { %430 = shalt.err (!%p427_p6)
}
  0x19   : > { %s431_s7 = scalar_lea.vmem %s547_s26, 512  ;;  %s482_s8 = smov [#allocation2]  }
  0x1a   : > { %p432_p11 = scmp.ne.s32.totalorder %s547_s26, %s431_s7  ;;  %s436_s9 = sshll.u32 %s482_s8, 4  ;;  %s437_s9 = int_to_ptr.vmem [resolvable:$false] %s436_s9 }
  0x1b   : > { %s438_s15 = scalar_lea.vmem %s437_s9, 1024  ;;  %p439_p10 = scmp.lt.s32.totalorder %s547_s26, %s437_s9 }
  0x1c   : > { %p434_p13 = pnand %p432_p11, %p418_p12  ;;  %p440_p1 = scmp.lt.s32.totalorder %s438_s15, %s431_s7 }
  0x1e   : > { %p435_p9 = pneg %p434_p13  ;;  %p441_p2 = por %p440_p1, %p439_p10 }
  0x20   : > { %p442_p3 = pnand %p441_p2, %p435_p9 }
  0x22   : > { %445 = shalt.err (!%p442_p3)
}
  0x23   : > { %369 = dma.hbm_to_vmem [thread:$0]  (!%p549_p8), %s545_s24, 512, %s547_s26, %s112_s28  }
  0x24   : > { %p623_p0 = scmp.lt.s32.totalorder %s480_s12, 3  ;;  %p624_p4 = scmp.ge.s32.totalorder %s480_s12, 1 }
  0x26   : > { %p136_p12 = pnand %p624_p4, %p623_p0 }
  0x27   : > { %s141_s16 = sand.u32 (!%p136_p12), 1, %s472_s10  }
  0x28   : > { %139 = sbr.rel (%p136_p12) target bundleno = 591 (0x24f), region = 28  ;;  %s352_s19 = sshll.u32 (!%p136_p12), %s141_s16, 5 }
  0x29   : > { %s142_s20 = scalar_lea.sflag (!%p136_p12), [#allocation3], %s141_s16  ;;  %s145_s21 = scalar_lea.vmem (!%p136_p12), [#allocation2], %s352_s19 }
  0x2f   : > { %463 = dma.done.wait (%p536_p7), %s142_s20, 512  }
  0x30   : > { %465 = vsyncadd (%p536_p7), %s142_s20, 4294966784  ;;  %v483_v0 = vmov 0   ;;  %v177_v1 = vld [vmem:[%s145_s21] sm:$0xff]  ;;  %v178_v2 = vld [vmem:[%s145_s21 + $0x8] sm:$0xff]  ;;  %p169_p8 = scmp.lt.s32.totalorder %s519_s13, 1  ;;  %v204_v9 = vlaneseq  ;;  %s355_s25 = sshll.u32 %s519_s13, 3 }
  0x31   : > { %405 = vset.pattern.permute.xlu0 %v483_v0  ;;  %v179_v3 = vld [vmem:[%s145_s21 + $0x10] sm:$0xff]  ;;  %v180_v4 = vld [vmem:[%s145_s21 + $0x18] sm:$0xff]  ;;  %v182_v5 = vmax.f32 %v177_v1, %v178_v2  ;;  %v232_v40 = vstv %s355_s25  ;;  %vm238_vm7 = vcmask 7168   ;;  %v484_v48 = vmov 0.0  }
  0x32   : > { %v183_v6 = vmax.f32 %v179_v3, %v180_v4  ;;  %s591_s12 = scalar_select %p169_p8, %s519_s13, 1  ;;  %v205_v14 = vand.u32 127, %v204_v9  ;;  %v230_v39 = vshrl.u32 %v204_v9, 7 }
  0x34   : > { %v184_v7 = vmax.f32 %v182_v5, %v183_v6  ;;  %s353_s22 = sshll.u32 %s591_s12, 3  ;;  %v206_v19 = vadd.s32 128, %v205_v14  ;;  %v207_v22 = vadd.s32 256, %v205_v14  ;;  %v208_v25 = vadd.s32 384, %v205_v14 }
  0x35   : > { %s172_s24 = scalar_lea.vmem %s619_s1, %s353_s22  ;;  %v233_v41 = vadd.s32 %v232_v40, %v230_v39  ;;  %vm262_vm8 = vcmp.eq.s32.totalorder %v230_v39, 1  ;;  %vm261_vm9 = vcmp.eq.s32.totalorder %v230_v39, 0  ;;  %s176_s29 = scalar_lea.vmem %s620_s2, %s353_s22 }
  0x36   : > { %185 = vmax.xlane.f32.xlu0 %v184_v7  ;;  %v181_v8 = vld [vmem:[%s172_s24] sm:$0xff] }
  0x37   : > { %vm234_vm4 = vcmp.ne.s32.totalorder %v181_v8, 4294967295  ;;  %vm235_vm5 = vcmp.lt.s32.totalorder %v233_v41, 16 }
  0x38   : > { %vm236_vm6 = vmand %vm234_vm4, %vm235_vm5 }
  0x39   : > { %v356_v49 = vsel %vm236_vm6, 1.0, %v484_v48 }
  0x3a   : > { %v251_v51 = vsel %vm238_vm7, %v356_v49, 0.0 }
  0x4c   : > { %210 = vperm.xlu0 %405, %v181_v8  }
  0xc3   : > { %v186_v10 = vpop.xlane.xlu0 %185 }
  0xc4   : > { %v187_v11 = vsub.f32 %v177_v1, %v186_v10  ;;  %v188_v12 = vsub.f32 %v178_v2, %v186_v10  ;;  %v189_v13 = vsub.f32 %v179_v3, %v186_v10  ;;  %v190_v15 = vsub.f32 %v180_v4, %v186_v10 }
  0xc6   : > { %v191_v16 = vmul.f32 1.442695, %v187_v11  ;;  %v193_v17 = vmul.f32 1.442695, %v188_v12  ;;  %v195_v18 = vmul.f32 1.442695, %v189_v13 }
  0xc7   : > { %v197_v20 = vmul.f32 1.442695, %v190_v15 }
  0xc8   : > { %406 = vpow2.f32 %v191_v16 }
  0xc9   : > { %408 = vpow2.f32 %v193_v17 }
  0xca   : > { %410 = vpow2.f32 %v195_v18 }
  0xcb   : > { %v211_v21 = vpop.permute.xlu0 %210  ;;  %412 = vpow2.f32 %v197_v20 }
  0xcc   : > { %vm212_vm0 = vcmp.eq.s32.totalorder %v205_v14, %v211_v21  ;;  %vm213_vm1 = vcmp.eq.s32.totalorder %v206_v19, %v211_v21  ;;  %vm214_vm2 = vcmp.eq.s32.totalorder %v207_v22, %v211_v21  ;;  %vm215_vm3 = vcmp.eq.s32.totalorder %v208_v25, %v211_v21 }
  0xcd   : > { %v216_v23 = vsel %vm212_vm0, %v177_v1, 0.0  ;;  %v217_v24 = vsel %vm213_vm1, %v178_v2, 0.0  ;;  %v218_v29 = vsel %vm214_vm2, %v179_v3, 0.0  ;;  %v219_v35 = vsel %vm215_vm3, %v180_v4, 0.0 }
  0xce   : > { %v220_v27 = vadd.f32 %v217_v24, %v216_v23 }
  0xd0   : > { %v221_v33 = vadd.f32 %v220_v27, %v218_v29 }
  0xd2   : > { %v407_v26 = vpop.eup %406  ;;  %v222_v37 = vadd.f32 %v221_v33, %v219_v35 }
  0xd3   : > { %v409_v28 = vpop.eup %408 }
  0xd4   : > { %v199_v30 = vadd.f32 %v409_v28, %v407_v26  ;;  %v411_v31 = vpop.eup %410 }
  0xd5   : > { %v413_v34 = vpop.eup %412 }
  0xd6   : > { %v200_v32 = vadd.f32 %v411_v31, %v199_v30 }
  0xd8   : > { %v201_v36 = vadd.f32 %v413_v34, %v200_v32 }
  0xda   : > { %202 = vadd.xlane.f32.xlu1 %v201_v36 }
  0xde   : > { %223 = vadd.xlane.f32.xlu1 %v222_v37 }
 0x167   : > { %v203_v38 = vpop.xlane.xlu1 %202 }
 0x168   : > { %414 = vlog2.f32 %v203_v38 }
 0x16b   : > { %v224_v45 = vpop.xlane.xlu1 %223 }
 0x172   : > { %v415_v42 = vpop.eup %414 }
 0x173   : > { %v226_v43 = vmul.f32 0.6931472, %v415_v42 }
 0x175   : > { %v227_v44 = vadd.f32 %v226_v43, %v186_v10 }
 0x177   : > { %v228_v46 = vsub.f32 %v227_v44, %v224_v45 }
 0x179   : > { %v237_v47 = vsel %vm236_vm6, %v228_v46, 0.0 }
 0x17a   : > { %v239_v50 = vsel %vm238_vm7, %v237_v47, 0.0 }
 0x17b   : > { %240 = vadd.xlane.f32.xlu1 %v239_v50 }
 0x17f   : > { %252 = vadd.xlane.f32.xlu1 %v251_v51 }
 0x208   : > { %v241_v52 = vpop.xlane.xlu1 %240 }
 0x209   : > { %v242_v53 = vrot.slane %v241_v52, 4 }
 0x20b   : > { %v243_v54 = vadd.f32 %v242_v53, %v241_v52 }
 0x20c   : > { %v253_v55 = vpop.xlane.xlu1 %252 }
 0x20d   : > { %v244_v56 = vrot.slane %v243_v54, 2  ;;  %v254_v57 = vrot.slane %v253_v55, 4 }
 0x20f   : > { %v255_v58 = vadd.f32 %v254_v57, %v253_v55  ;;  %v245_v59 = vadd.f32 %v244_v56, %v243_v54 }
 0x211   : > { %v256_v60 = vrot.slane %v255_v58, 2  ;;  %v246_v61 = vrot.slane %v245_v59, 1 }
 0x213   : > { %v257_v62 = vadd.f32 %v256_v60, %v255_v58  ;;  %v247_v63 = vadd.f32 %v246_v61, %v245_v59 }
 0x215   : > { %360 = vpush %v247_v63  ;;  %v258_v0 = vrot.slane %v257_v62, 1 }
 0x217   : > { %v259_v1 = vadd.f32 %v258_v0, %v257_v62 }
 0x219   : > { %362 = vpush %v259_v1 }
 0x246   : > { %s361_s13 = spop %360 }
 0x247   : > { %v265_v3 = vstv %s361_s13 }
 0x24a   : > { %s363_s26 = spop %362 }
 0x24b   : > { %v263_v2 = vstv %s363_s26 }
 0x24c   : > { %v264_v4 = vsel %vm262_vm8, %v263_v2, 0.0 }
 0x24d   : > { %v266_v5 = vsel %vm261_vm9, %v265_v3, %v264_v4 }
 0x24e   : > { %267 = vst [vmem:[%s176_s29] sm:$0xff] %v266_v5 }
 0x24f PF: > { %p12_p7 = scmp.ge.s32.totalorder %s522_s14, 4   ;;  %s625_s9 = smov %s472_s10 }
 0x250   : > { %s626_s10 = smov %s476_s11  ;;  %s627_s11 = smov %s532_s17 }
 0x251   : > { %s628_s12 = smov %s522_s14  ;;  %14 = sbr.rel (!%p12_p7) target bundleno = 3 (0x3), region = 71 }
 0x258   :  { %287 = vsyncpa [#allocation3], 1 }
 0x259   :  { %289 = vsyncpa [#allocation3 + $0x1], 1 }

</bundles_post_ra>
